<compile_context>
chip_gen: v5e
topology: v5e:2x2
jax: 0.10.0
libtpu: 0.0.40
codegen_flags: <defaults>
</compile_context>

<pallas_src>
import functools

import jax
import jax.numpy as jnp
from jax.experimental import pallas as pl
from jax.experimental.pallas import tpu as pltpu


def _scbnorm_kernel(cid_ref, x_ref, wm_ref, bm_ref, ws_ref, bs_ref, o_ref, *, epsilon):
    # cid_ref (SMEM scalar prefetch) is only consumed by the weight-row index_maps.
    del cid_ref

    # Per-tile statistics from the gathered weight row: (1, L) adds + one exp on the
    # EUP + one reciprocal. Recomputing per tile keeps both grid axes independent.
    mean = wm_ref[0] + bm_ref[...]                                      # (1, L) f32
    inv = pl.reciprocal(jnp.exp(ws_ref[0] + bs_ref[...]) + epsilon)     # (1, L) f32

    # Memory-bound stream: upcast per-vreg to f32, compute, cast only on store.
    x = x_ref[...].astype(jnp.float32)                                  # (1, tS, L)
    o_ref[...] = ((x - mean[:, None, :]) * inv[:, None, :]).astype(o_ref.dtype)


def _buffered_spec(block_shape, index_map, depth):
    """BlockSpec with requested pipeline depth; fall back to default double-buffering."""
    if depth > 2 and hasattr(pl, "Buffered"):
        try:
            return pl.BlockSpec(block_shape, index_map, pipeline_mode=pl.Buffered(depth))
        except Exception:
            pass
    return pl.BlockSpec(block_shape, index_map)


def scb_norm_base(x, cluster_id_onehot, w_mean, b_mean, w_std, b_std, epsilon=1e-3):
    """Pallas TPU forward of SCBNormBase.

    x:                 (B, ..., D); mean/std broadcast over all middle dims.
    cluster_id_onehot: (B, C) one-hot (int/float) cluster ids, or (B,) integer ids.
    w_mean, w_std:     (C, D)  -- torch nn.Linear weight (D, C) transposed.
    b_mean, b_std:     (D,)
    Returns an array with the same shape/dtype as x.
    """
    orig_shape = x.shape
    B, D = int(x.shape[0]), int(x.shape[-1])
    S = 1
    for d in x.shape[1:-1]:
        S *= int(d)
    x2 = x.reshape(B, S, D)

    # Integer cluster index (weight-row gather == Linear(one_hot)).
    # TODO(synk): soft / non-one-hot cluster encodings would need the (B,C)x(C,D) matmul path.
    if cluster_id_onehot.ndim == 1:
        cid = cluster_id_onehot.astype(jnp.int32)
    else:
        cid = jnp.argmax(cluster_id_onehot, axis=-1).astype(jnp.int32)

    # ---- lane-dense layout: make the kernel's last dim a multiple of 128 ----------
    LANES = 128
    if D % LANES == 0:
        Dp, fold = D, 1
    elif D < LANES:
        Dp = 1
        while Dp < D:
            Dp *= 2                       # next power of two -> divides 128
        fold = LANES // Dp
    else:
        Dp = ((D + LANES - 1) // LANES) * LANES
        fold = 1
    if Dp != D:
        x2 = jnp.pad(x2, ((0, 0), (0, 0), (0, Dp - D)))
    S_pad = ((S + fold - 1) // fold) * fold
    if S_pad != S:
        x2 = jnp.pad(x2, ((0, 0), (0, S_pad - S), (0, 0)))
    L = Dp * fold
    S_f = S_pad // fold
    x2 = x2.reshape(B, S_f, L)

    C = int(w_mean.shape[0])

    def prep_w(w):
        w = w.astype(jnp.float32)
        if Dp != D:
            w = jnp.pad(w, ((0, 0), (0, Dp - D)))
        return jnp.tile(w, (1, fold)).reshape(C, 1, L)

    def prep_b(b):
        b = b.astype(jnp.float32)
        if Dp != D:
            b = jnp.pad(b, (0, Dp - D))
        return jnp.tile(b, fold).reshape(1, L)

    wm, ws = prep_w(w_mean), prep_w(w_std)
    bm, bs = prep_b(b_mean), prep_b(b_std)

    # ---- tiling: ~4 MiB x tiles (HBM-streaming sweet spot on v5e/v6e/v7x),
    # sublane-aligned for the dtype's packing ---------------------------------------
    itemsize = jnp.dtype(x.dtype).itemsize
    sub = max(8, 32 // itemsize)                     # 8 rows f32, 16 bf16, 32 int8
    budget = 4 << 20                                 # bytes per x tile
    rows = max(sub, budget // max(1, L * itemsize))
    rows = (rows // sub) * sub
    tS = S_f if S_f <= rows else rows
    grid = (B, pl.cdiv(S_f, tS))
    depth = 3 if grid[1] > 1 else 2                  # extra buffer only helps when streaming

    kernel = functools.partial(_scbnorm_kernel, epsilon=float(epsilon))

    grid_spec = pltpu.PrefetchScalarGridSpec(
        num_scalar_prefetch=1,                       # cid -> SMEM
        grid=grid,
        in_specs=[
            _buffered_spec((1, tS, L), lambda b, s, c_ref: (b, s, 0), depth),        # x tile
            pl.BlockSpec((1, 1, L), lambda b, s, c_ref: (c_ref[b], 0, 0)),           # W_mean row
            pl.BlockSpec((1, L), lambda b, s, c_ref: (0, 0)),                        # b_mean
            pl.BlockSpec((1, 1, L), lambda b, s, c_ref: (c_ref[b], 0, 0)),           # W_std row
            pl.BlockSpec((1, L), lambda b, s, c_ref: (0, 0)),                        # b_std
        ],
        out_specs=_buffered_spec((1, tS, L), lambda b, s, c_ref: (b, s, 0), depth),
    )

    tile_bytes = tS * L * itemsize
    vmem_limit = int(min(56 << 20, max(32 << 20, int(2.5 * depth * tile_bytes))))

    cost = pl.CostEstimate(
        flops=2 * B * S * D,
        transcendentals=B * grid[1] * L,
        bytes_accessed=2 * B * S * D * itemsize + 2 * C * D * 4,
    )

    out = pl.pallas_call(
        kernel,
        out_shape=jax.ShapeDtypeStruct((B, S_f, L), x.dtype),
        grid_spec=grid_spec,
        compiler_params=pltpu.CompilerParams(
            dimension_semantics=("parallel", "parallel"),   # both axes shardable (v7x 2 TCs)
            vmem_limit_bytes=vmem_limit,
        ),
        cost_estimate=cost,
    )(cid, x2, wm, bm, ws, bs)

    out = out.reshape(B, S_pad, Dp)
    if S_pad != S or Dp != D:
        out = out[:, :S, :D]
    return out.reshape(orig_shape)


def _reference(x, cluster_onehot, w_mean, b_mean, w_std, b_std, epsilon):
    cid_f = cluster_onehot.astype(jnp.float32)
    mean = cid_f @ w_mean + b_mean
    std = jnp.exp(cid_f @ w_std + b_std)
    bshape = (x.shape[0],) + (1,) * (x.ndim - 2) + (x.shape[-1],)
    return (x - mean.reshape(bshape)) / (std.reshape(bshape) + epsilon)


if __name__ == "__main__":
    epsilon = 1e-3
    key = jax.random.PRNGKey(0)
    kx, kc, kwm, kbm, kws, kbs, kx2, kc2 = jax.random.split(key, 8)

    # ---- case 1: num_clusters=4, input_dim=32, x of shape (B=2, S=8, D=32) --------
    num_clusters, input_dim, B, S = 4, 32, 2, 8
    x = jax.random.normal(kx, (B, S, input_dim), dtype=jnp.float32)
    cluster_ids = jax.random.randint(kc, (B,), 0, num_clusters)
    cluster_onehot = jax.nn.one_hot(cluster_ids, num_clusters, dtype=jnp.int32)

    bound = 1.0 / (num_clusters ** 0.5)
    w_mean = jax.random.uniform(kwm, (num_clusters, input_dim), jnp.float32, -bound, bound)
    b_mean = jax.random.uniform(kbm, (input_dim,), jnp.float32, -bound, bound)
    w_std = jax.random.uniform(kws, (num_clusters, input_dim), jnp.float32, -bound, bound)
    b_std = jax.random.uniform(kbs, (input_dim,), jnp.float32, -bound, bound)

    out = scb_norm_base(x, cluster_onehot, w_mean, b_mean, w_std, b_std, epsilon)
    out = jax.block_until_ready(out)
    ref = _reference(x, cluster_onehot, w_mean, b_mean, w_std, b_std, epsilon)
    assert out.shape == x.shape and out.dtype == x.dtype
    assert jnp.allclose(out, ref, atol=1e-5, rtol=1e-5), float(jnp.max(jnp.abs(out - ref)))

    # ---- case 2: exercises the padding fallback (D=24 not a divisor of 128, S=5) --
    D2, S2 = 24, 5
    x_b = jax.random.normal(kx2, (B, S2, D2), dtype=jnp.float32)
    cluster_onehot_b = jax.nn.one_hot(
        jax.random.randint(kc2, (B,), 0, num_clusters), num_clusters, dtype=jnp.int32)
    w_mean_b, b_mean_b = w_mean[:, :D2], b_mean[:D2]
    w_std_b, b_std_b = w_std[:, :D2], b_std[:D2]
    out_b = scb_norm_base(x_b, cluster_onehot_b, w_mean_b, b_mean_b, w_std_b, b_std_b, epsilon)
    out_b = jax.block_until_ready(out_b)
    ref_b = _reference(x_b, cluster_onehot_b, w_mean_b, b_mean_b, w_std_b, b_std_b, epsilon)
    assert out_b.shape == x_b.shape and out_b.dtype == x_b.dtype
    assert jnp.allclose(out_b, ref_b, atol=1e-5, rtol=1e-5), float(jnp.max(jnp.abs(out_b - ref_b)))

    print("KERNEL_OK")
</pallas_src>

<mosaic_0001>
module attributes {stable_mosaic.version = 11 : i64} {
  func.func @_scbnorm_kernel(%arg0: i32, %arg1: i32, %arg2: memref<2xi32, #tpu.memory_space<smem>>, %arg3: memref<1x2x128xf32, #tpu.memory_space<vmem>>, %arg4: memref<1x1x128xf32, #tpu.memory_space<vmem>>, %arg5: memref<1x128xf32, #tpu.memory_space<vmem>>, %arg6: memref<1x1x128xf32, #tpu.memory_space<vmem>>, %arg7: memref<1x128xf32, #tpu.memory_space<vmem>>, %arg8: memref<1x2x128xf32, #tpu.memory_space<vmem>>) attributes {dimension_semantics = [#tpu.dimension_semantics<parallel>, #tpu.dimension_semantics<parallel>], iteration_bounds = array<i64: 2, 1>, scalar_prefetch = 1 : i64, scratch_operands = 0 : i64, tpu.core_type = #tpu.core_type<tc>, window_params = [{transform_indices = @transform_0, window_bounds = array<i64: 1, 2, 128>}, {transform_indices = @transform_1, window_bounds = array<i64: 1, 1, 128>}, {pipeline_mode = #tpu.pipeline_mode<synchronous>, transform_indices = @transform_2, window_bounds = array<i64: 1, 128>}, {transform_indices = @transform_3, window_bounds = array<i64: 1, 1, 128>}, {pipeline_mode = #tpu.pipeline_mode<synchronous>, transform_indices = @transform_4, window_bounds = array<i64: 1, 128>}, {transform_indices = @transform_5, window_bounds = array<i64: 1, 2, 128>}]} {
    %c0 = arith.constant 0 : index
    %c0_0 = arith.constant 0 : index
    %c0_1 = arith.constant 0 : index
    %0 = vector.load %arg4[%c0, %c0_0, %c0_1] : memref<1x1x128xf32, #tpu.memory_space<vmem>>, vector<1x1x128xf32>
    %1 = vector.shape_cast %0 : vector<1x1x128xf32> to vector<1x128xf32>
    %c0_2 = arith.constant 0 : index
    %c0_3 = arith.constant 0 : index
    %2 = vector.load %arg5[%c0_2, %c0_3] : memref<1x128xf32, #tpu.memory_space<vmem>>, vector<1x128xf32>
    %3 = arith.addf %1, %2 : vector<1x128xf32>
    %c0_4 = arith.constant 0 : index
    %c0_5 = arith.constant 0 : index
    %c0_6 = arith.constant 0 : index
    %4 = vector.load %arg6[%c0_4, %c0_5, %c0_6] : memref<1x1x128xf32, #tpu.memory_space<vmem>>, vector<1x1x128xf32>
    %5 = vector.shape_cast %4 : vector<1x1x128xf32> to vector<1x128xf32>
    %c0_7 = arith.constant 0 : index
    %c0_8 = arith.constant 0 : index
    %6 = vector.load %arg7[%c0_7, %c0_8] : memref<1x128xf32, #tpu.memory_space<vmem>>, vector<1x128xf32>
    %7 = arith.addf %5, %6 : vector<1x128xf32>
    %8 = math.exp %7 : vector<1x128xf32>
    %cst = arith.constant 1.000000e-03 : f32
    %9 = vector.broadcast %cst : f32 to vector<1x128xf32>
    %10 = arith.addf %8, %9 : vector<1x128xf32>
    %11 = tpu.reciprocal %10 : vector<1x128xf32> -> vector<1x128xf32>
    %c0_9 = arith.constant 0 : index
    %c0_10 = arith.constant 0 : index
    %c0_11 = arith.constant 0 : index
    %12 = vector.load %arg3[%c0_9, %c0_10, %c0_11] : memref<1x2x128xf32, #tpu.memory_space<vmem>>, vector<1x2x128xf32>
    %13 = vector.shape_cast %3 : vector<1x128xf32> to vector<1x1x128xf32>
    %14 = vector.broadcast %13 : vector<1x1x128xf32> to vector<1x2x128xf32>
    %15 = arith.subf %12, %14 : vector<1x2x128xf32>
    %16 = vector.shape_cast %11 : vector<1x128xf32> to vector<1x1x128xf32>
    %17 = vector.broadcast %16 : vector<1x1x128xf32> to vector<1x2x128xf32>
    %18 = arith.mulf %15, %17 : vector<1x2x128xf32>
    %c0_12 = arith.constant 0 : index
    %c0_13 = arith.constant 0 : index
    %c0_14 = arith.constant 0 : index
    %19 = vector.load %arg8[%c0_12, %c0_13, %c0_14] : memref<1x2x128xf32, #tpu.memory_space<vmem>>, vector<1x2x128xf32>
    tpu.vector_store %arg8[%c0_12, %c0_13, %c0_14], %18 {strides = array<i32>} : memref<1x2x128xf32, #tpu.memory_space<vmem>>, vector<1x2x128xf32>,
    return
  }
  func.func @transform_0(%arg0: i32, %arg1: i32, %arg2: memref<2xi32, #tpu.memory_space<smem>>) -> (i32, i32, i32) {
    %c0_i32 = arith.constant 0 : i32
    %c0_i32_0 = arith.constant 0 : i32
    return %arg0, %arg1, %c0_i32 : i32, i32, i32
  }
  func.func @transform_1(%arg0: i32, %arg1: i32, %arg2: memref<2xi32, #tpu.memory_space<smem>>) -> (i32, i32, i32) {
    %0 = arith.index_cast %arg0 : i32 to index
    %1 = memref.load %arg2[%0] : memref<2xi32, #tpu.memory_space<smem>>
    %c0_i32 = arith.constant 0 : i32
    %c0_i32_0 = arith.constant 0 : i32
    %c0_i32_1 = arith.constant 0 : i32
    return %1, %c0_i32, %c0_i32_0 : i32, i32, i32
  }
  func.func @transform_2(%arg0: i32, %arg1: i32, %arg2: memref<2xi32, #tpu.memory_space<smem>>) -> (i32, i32) {
    %c0_i32 = arith.constant 0 : i32
    %c0_i32_0 = arith.constant 0 : i32
    %c0_i32_1 = arith.constant 0 : i32
    return %c0_i32, %c0_i32_0 : i32, i32
  }
  func.func @transform_3(%arg0: i32, %arg1: i32, %arg2: memref<2xi32, #tpu.memory_space<smem>>) -> (i32, i32, i32) {
    %0 = arith.index_cast %arg0 : i32 to index
    %1 = memref.load %arg2[%0] : memref<2xi32, #tpu.memory_space<smem>>
    %c0_i32 = arith.constant 0 : i32
    %c0_i32_0 = arith.constant 0 : i32
    %c0_i32_1 = arith.constant 0 : i32
    return %1, %c0_i32, %c0_i32_0 : i32, i32, i32
  }
  func.func @transform_4(%arg0: i32, %arg1: i32, %arg2: memref<2xi32, #tpu.memory_space<smem>>) -> (i32, i32) {
    %c0_i32 = arith.constant 0 : i32
    %c0_i32_0 = arith.constant 0 : i32
    %c0_i32_1 = arith.constant 0 : i32
    return %c0_i32, %c0_i32_0 : i32, i32
  }
  func.func @transform_5(%arg0: i32, %arg1: i32, %arg2: memref<2xi32, #tpu.memory_space<smem>>) -> (i32, i32, i32) {
    %c0_i32 = arith.constant 0 : i32
    %c0_i32_0 = arith.constant 0 : i32
    return %arg0, %arg1, %c0_i32 : i32, i32, i32
  }
}

</mosaic_0001>

<bundles_post_ra>
// kernel: tpu_custom_call.1
= control target key start
LH: loop header
LB: loop body
LE: loop exit
PB: predicated region body
PF: predicated region fallthrough
CT: control target
= control target key end

     0   :  { %s898_s24 = smov [#allocation3]   ;;  %s1252_s0 = inlined_call_operand.hbm [shape: s32[2], index: 0, kind: input, shape index: {}]   ;;  %s1253_s1 = inlined_call_operand.hbm [shape: f32[2,2,128], index: 1, kind: input, shape index: {}]   ;;  %s1254_s2 = inlined_call_operand.hbm [shape: f32[4,1,128], index: 2, kind: input, shape index: {}]   ;;  %s1255_s3 = inlined_call_operand.vmem [shape: f32[1,128], index: 3, kind: input, shape index: {}]   ;;  %s1256_s4 = inlined_call_operand.hbm [shape: f32[4,1,128], index: 4, kind: input, shape index: {}]   ;;  %s1257_s5 = inlined_call_operand.vmem [shape: f32[1,128], index: 5, kind: input, shape index: {}]   ;;  %s1258_s6 = inlined_call_operand.hbm [shape: f32[2,2,128], index: 6, kind: output, shape index: {}]  }
   0x1   :  { %1266 = sst [smem:[#allocation27_spill]] %s1253_s1  ;;  %s12_s23 = sshll.u32 %s1252_s0, 4  ;;  %s13_s23 = int_to_ptr.hbm [resolvable:$true] %s12_s23 }
   0x2   :  { %1267 = sst [smem:[#allocation28_spill]] %s1254_s2 }
   0x3   :  { %1268 = sst [smem:[#allocation29_spill]] %s1255_s3 }
   0x4   :  { %1269 = sst [smem:[#allocation30_spill]] %s1257_s5 }
   0x5   :  { %1270 = sst [smem:[#allocation31_spill]] %s1258_s6 }
   0x6   :  { %15 = dma.hbm_to_smem %s13_s23, 16, %s898_s24, [#allocation2] }
   0x7   :  { %832 = dma.done.wait [#allocation2], 16 }
   0x8   :  { %833 = vsyncadd [#allocation2], 4294967280 }
   0x9   :  { %18 = sfence }
   0xa   :  { %19 = vsyncpa [#allocation5], 0 }
   0xb   :  { %21 = vsyncpa [#allocation5 + $0x1], 0 }
   0xc   :  { %22 = vsyncpa [#allocation8], 0 }
   0xd   :  { %24 = vsyncpa [#allocation8 + $0x1], 0 }
   0xe   :  { %25 = vsyncpa [#allocation6], 0 }
   0xf   :  { %27 = vsyncpa [#allocation6 + $0x1], 0  ;;  %s937_s25 = smov 0   ;;  %s939_s26 = smov 0  }
  0x10   :  { %s941_s27 = smov 0   ;;  %s943_s28 = smov 0  }
  0x11   :  { %s945_s0 = smov 0   ;;  %s947_s29 = smov 0  }
  0x12   :  { %s949_s30 = smov 0   ;;  %s951_s7 = smov 0  }
  0x13   :  { %s953_s8 = smov 0   ;;  %s955_s9 = smov 0  }
  0x14   :  { %s957_s10 = smov 0   ;;  %s959_s11 = smov 0  }
  0x15 LB: > { %1271 = sst [smem:[#allocation20_spill]] %s872_s29  ;;  %s996_s12 = sadd.s32 4294967295, %s896_s11   ;;  %s896_s11 = sphi %s959_s11, %s33_s11   ;;  %s892_s10 = sphi %s957_s10, %s1306_s10   ;;  %s888_s9 = sphi %s955_s9, %s1305_s9   ;;  %s884_s8 = sphi %s953_s8, %s1304_s8   ;;  %s880_s7 = sphi %s951_s7, %s1314_s7   ;;  %s876_s30 = sphi %s949_s30, %s1313_s30   ;;  %s872_s29 = sphi %s947_s29, %s1312_s29   ;;  %s868_s0 = sphi %s945_s0, %s1311_s0   ;;  %s864_s28 = sphi %s943_s28, %s1310_s28   ;;  %s860_s27 = sphi %s941_s27, %s1309_s27   ;;  %s856_s26 = sphi %s939_s26, %s1308_s26   ;;  %s852_s25 = sphi %s937_s25, %s1307_s25  }
  0x16   : > { %1272 = sst [smem:[#allocation21_spill]] %s884_s8  ;;  %s45_s13 = sadd.s32 1, %s892_s10 }
  0x17   : > { %1273 = sst [smem:[#allocation22_spill]] %s888_s9  ;;  %p47_p0 = scmp.ge.s32.totalorder %s45_s13, 2 }
  0x18   : > { %1274 = sst [smem:[#allocation23_spill]] %s892_s10  ;;  %p62_p1 = scmp.eq.s32.totalorder %s896_s11, 0 }
  0x19   : > { %p68_p2 = scmp.eq.s32.totalorder %s996_s12, 0  ;;  %s77_s14 = sld [smem:[#allocation3 + %s892_s10]] }
  0x1a   : > { %s1316_s13 = smov (%p47_p0, %s45_s13), 0  ;;  %s82_s15 = sadd.s32 1, %s872_s29 }
  0x1b   : > { %1275 = sst [smem:[#allocation24_spill]] %s1316_s13  ;;  %p89_p3 = scmp.ne.s32.totalorder %s872_s29, %s868_s0 }
  0x1c   : > { %s78_s16 = sld [smem:[#allocation3 + %s1316_s13]]  ;;  %p95_p4 = scmp.ne.s32.totalorder %s868_s0, %s864_s28 }
  0x1d   : > { %p1011_p5 = por %p89_p3, %p62_p1  ;;  %p1261_p8 = scmp.lt.s32.totalorder %s896_s11, 2 }
  0x1e   : > { %p1018_p7 = por %p95_p4, %p68_p2  ;;  %s243_s19 = sand.u32 1, %s896_s11  }
  0x1f   : > { %s245_s20 = sand.u32 1, %s872_s29   ;;  %p1043_p10 = pnand %p1261_p8, %p1011_p5 }
  0x20   : > { %s522_s21 = scalar_select %p1011_p5, [#allocation3], [#allocation11] }
  0x21   : > { %s246_s23 = scalar_lea.vmem [#allocation7], %s245_s20  ;;  %p514_p11 = scmp.ge.s32.totalorder %s896_s11, 1 }
  0x22   : > { %s79_s22 = ssub.s32 %s77_s14, %s78_s16  ;;  %s254_s24 = sshll.u32 %s246_s23, 4  ;;  %s1027_s24 = int_to_ptr.vmem [resolvable:$true] %s254_s24 }
  0x23   : > { %p80_p9 = scmp.eq.s32.totalorder %s79_s22, 0  ;;  %s1318_s21 = smov (!%p1261_p8, %s522_s21), [#allocation13] }
  0x24   : > { %s523_s28 = scalar_select %p1011_p5, %s892_s10, 0 }
  0x25   : > { %s1033_s6 = scalar_select %p80_p9, %s872_s29, %s82_s15  }
  0x26   : > { %s1320_s28 = smov (!%p1261_p8, %s523_s28), 0  ;;  %p277_p12 = scmp.lt.s32.totalorder %s896_s11, 3 }
  0x27   : > { %1278 = sst [smem:[#allocation25_spill]] %s1033_s6  ;;  %s509_s23 = sadd.s32 4294967294, %s896_s11  }
  0x28   : > { %s247_s14 = sld [smem:[%s1318_s21 + %s1320_s28]]  ;;  %p1049_p13 = pnand %p514_p11, %p277_p12 }
  0x29   : > { %s1281_s2 = sld [smem:[#allocation28_spill]]  ;;  %s49_s17 = ssub.s32 %s892_s10, %s1316_s13 }
  0x2a   : > { %p1059_p0 = scmp.eq.s32.totalorder %s49_s17, 0  ;;  %s1063_s9 = scalar_lea.sflag [#allocation8], %s243_s19 }
  0x2b   : > { %p670_p4 = pneg %p1043_p10 }
  0x2f   : > { %s250_s22 = scalar_lea.hbm %s1281_s2, %s247_s14  ;;  %s673_s20 = scalar_lea.hbm %s1281_s2, 4 }
  0x30   : > { %s252_s6 = sshll.u32 %s250_s22, 4  ;;  %s253_s6 = int_to_ptr.hbm [resolvable:$true] %s252_s6 }
  0x31   : > { %s666_s21 = sshra.s32 %s253_s6, 4  ;;  %s667_s21 = int_to_ptr.hbm [resolvable:$true] %s666_s21 }
  0x32   : > { %s668_s28 = scalar_lea.hbm %s667_s21, 1  ;;  %p674_p11 = scmp.lt.s32.totalorder %s667_s21, %s1281_s2 }
  0x33   : > { %p669_p3 = scmp.ne.s32.totalorder %s667_s21, %s668_s28  ;;  %p675_p12 = scmp.lt.s32.totalorder %s673_s20, %s668_s28 }
  0x35   : > { %p671_p5 = pnand %p670_p4, %p669_p3  ;;  %p676_p6 = por %p675_p12, %p674_p11 }
  0x37   : > { %p672_p9 = pneg %p671_p5 }
  0x39   : > { %p677_p8 = pnand %p676_p6, %p672_p9 }
  0x3b   : > { %680 = shalt.err (!%p677_p8)
}
  0x3c   : > { %541 = dma.hbm_to_vmem [thread:$0]  (!%p1043_p10), %s253_s6, 16, %s1027_s24, %s1063_s9  }
  0x3d   : > { %s54_s5 = sadd.s32 1, %s884_s8  ;;  %p61_p6 = scmp.ne.s32.totalorder %s884_s8, %s880_s7 }
  0x3e   : > { %s1083_s19 = scalar_select %p1059_p0, %s884_s8, %s54_s5  }
  0x3f   : > { %p1087_p8 = por %p62_p1, %p61_p6  ;;  %p67_p3 = scmp.ne.s32.totalorder %s880_s7, %s876_s30 }
  0x40   : > { %1283 = sst [smem:[#allocation26_spill]] %s1083_s19  ;;  %p191_p4 = scmp.eq.s32.totalorder %s996_s12, 1 }
  0x41   : > { %p197_p5 = scmp.eq.s32.totalorder %s509_s23, 1  ;;  %p1096_p9 = por %p68_p2, %p67_p3 }
  0x42   : > { %s223_s6 = sand.u32 1, %s884_s8   ;;  %p1101_p10 = por %p191_p4, %p61_p6 }
  0x43   : > { %p1105_p0 = por %p197_p5, %p67_p3  ;;  %s512_s23 = sshll.u32 %s223_s6, 1 }
  0x44   : > { %s1286_s29 = scalar_select %p1101_p10, 1, 0 }
  0x45   : > { %s1287_s24 = scalar_select %p1105_p0, 1, 0 }
  0x46   : > { %s513_s21 = sshll.u32 %s892_s10, 1  ;;  %s1288_s1 = sld [smem:[#allocation27_spill]] }
  0x47   : > { %s227_s20 = scalar_lea.vmem [#allocation4], %s512_s23  ;;  %p1289_p11 = scmp.lt.s32.totalorder %s896_s11, 2 }
  0x48   : > { %s236_s22 = sshll.u32 %s227_s20, 4  ;;  %s224_s2 = scalar_lea.sflag [#allocation5], %s223_s6  ;;  %s237_s22 = int_to_ptr.vmem [resolvable:$true] %s236_s22 }
  0x49   : > { %p534_p12 = pnand %p1289_p11, %p1087_p8  ;;  %s126_s19 = sld [smem:[#allocation3 + %s892_s10]] }
  0x4a   : > { %s127_s28 = sld [smem:[#allocation3 + %s1316_s13]]  ;;  %p138_p6 = scmp.ne.s32.totalorder %s860_s27, %s856_s26 }
  0x4b   : > { %p144_p3 = scmp.ne.s32.totalorder %s856_s26, %s852_s25  ;;  %s131_s15 = sadd.s32 1, %s860_s27 }
  0x4c   : > { %s232_s14 = scalar_lea.hbm %s1288_s1, %s513_s21  ;;  %p140_p4 = por %p138_p6, %p62_p1 }
  0x4d   : > { %s234_s5 = sshll.u32 %s232_s14, 4  ;;  %p1127_p5 = por %p144_p3, %p68_p2  ;;  %s235_s5 = int_to_ptr.hbm [resolvable:$true] %s234_s5 }
  0x4e   : > { %536 = dma.hbm_to_vmem [thread:$0]  (!%p534_p12), %s235_s5, 32, %s237_s22, %s224_s2  }
  0x4f   : > { %s525_s3 = scalar_select %p140_p4, [#allocation3], [#allocation12] }
  0x50   : > { %s128_s21 = ssub.s32 %s126_s19, %s127_s28  ;;  %s263_s14 = sand.u32 1, %s860_s27  }
  0x51   : > { %p129_p8 = scmp.eq.s32.totalorder %s128_s21, 0  ;;  %s1322_s3 = smov (!%p1289_p11, %s525_s3), [#allocation14] }
  0x52   : > { %s526_s6 = scalar_select %p140_p4, %s892_s10, 0 }
  0x53   : > { %s1135_s20 = scalar_select %p129_p8, %s860_s27, %s131_s15  }
  0x54   : > { %p1291_p12 = pmov %p1289_p11  ;;  %p1292_p0 = pmov %p1289_p11 }
  0x55   : > { %s264_s22 = scalar_lea.vmem [#allocation9], %s263_s14 }
  0x56   : > { %s1324_s6 = smov (!%p1291_p12, %s526_s6), 0  ;;  %p1143_p10 = pnand %p1292_p0, %p140_p4 }
  0x57   : > { %s265_s25 = sld [smem:[%s1322_s3 + %s1324_s6]]  ;;  %s272_s5 = sshll.u32 %s264_s22, 4  ;;  %s273_s5 = int_to_ptr.vmem [resolvable:$true] %s272_s5 }
  0x58   : > { %p730_p2 = pneg %p1143_p10  ;;  %s733_s3 = scalar_lea.hbm %s1256_s4, 4 }
  0x5d   : > { %s268_s21 = scalar_lea.hbm %s1256_s4, %s265_s25 }
  0x5e   : > { %s270_s15 = sshll.u32 %s268_s21, 4  ;;  %s271_s15 = int_to_ptr.hbm [resolvable:$true] %s270_s15 }
  0x5f   : > { %s726_s1 = sshra.s32 %s271_s15, 4  ;;  %s727_s1 = int_to_ptr.hbm [resolvable:$true] %s726_s1 }
  0x60   : > { %s728_s13 = scalar_lea.hbm %s727_s1, 1  ;;  %p734_p3 = scmp.lt.s32.totalorder %s727_s1, %s1256_s4 }
  0x61   : > { %p729_p1 = scmp.ne.s32.totalorder %s727_s1, %s728_s13  ;;  %p735_p4 = scmp.lt.s32.totalorder %s733_s3, %s728_s13 }
  0x63   : > { %p731_p0 = pnand %p730_p2, %p729_p1  ;;  %p736_p8 = por %p735_p4, %p734_p3 }
  0x65   : > { %p732_p6 = pneg %p731_p0 }
  0x67   : > { %p737_p11 = pnand %p736_p8, %p732_p6 }
  0x69   : > { %740 = shalt.err (!%p737_p11)
}
  0x6a   : > { %546 = dma.hbm_to_vmem [thread:$0]  (!%p1143_p10), %s271_s15, 16, %s273_s5, %s1063_s9  }
  0x6b   : > { %281 = sbr.rel (%p1049_p13) target bundleno = 163 (0xa3), region = 40  ;;  %s1164_s25 = sand.u32 (!%p1049_p13), 1, %s880_s7  }
  0x6c   : > { %s515_s8 = sshll.u32 (!%p1049_p13), %s1164_s25, 1  ;;  %s284_s1 = scalar_lea.sflag (!%p1049_p13), [#allocation5], %s1164_s25 }
  0x6d   : > { %s1170_s10 = scalar_lea.vmem (!%p1049_p13), [#allocation4], %s515_s8 }
  0x70   : > { %835 = dma.done.wait (%p1096_p9), %s284_s1, 32  }
  0x71   : > { %837 = vsyncadd (%p1096_p9), %s284_s1, 4294967264  ;;  %s293_s9 = sand.u32 1, %s996_s12   ;;  %s295_s13 = sand.u32 1, %s868_s0  }
  0x72   : > { %s294_s16 = scalar_lea.sflag [#allocation8], %s293_s9  ;;  %s296_s2 = scalar_lea.vmem [#allocation7], %s295_s13 }
  0x73   : > { %839 = dma.done.wait (%p1018_p7), %s294_s16, 16  }
  0x74   : > { %841 = vsyncadd (%p1018_p7), %s294_s16, 4294967280  ;;  %s304_s22 = sand.u32 1, %s856_s26  }
  0x75   : > { %s305_s5 = scalar_lea.vmem [#allocation9], %s304_s22 }
  0x76   : > { %843 = dma.done.wait (%p1127_p5), %s294_s16, 16  }
  0x77   : > { %845 = vsyncadd (%p1127_p5), %s294_s16, 4294967280  ;;  %v346_v0 = vld [vmem:[%s305_s5] sm:$0x1]  ;;  %s1294_s19 = sld [smem:[#allocation30_spill]]  ;;  %s340_s9 = scalar_lea.vmem [#allocation10], %s515_s8 }
  0x78   : > { %s1295_s28 = sld [smem:[#allocation22_spill]]  ;;  %v343_v6 = vld [vmem:[%s296_s2] sm:$0x1]  ;;  %s390_s13 = sshll.u32 %s340_s9, 4  ;;  %s391_s13 = int_to_ptr.vmem [resolvable:$true] %s390_s13 }
  0x79   : > { %s1296_s15 = sld [smem:[#allocation29_spill]]  ;;  %v366_v17 = vld [vmem:[%s1170_s10] sm:$0x3]  ;;  %s377_s10 = scalar_lea.sflag [#allocation6], %s1164_s25 }
  0x7a   : > { %s1297_s6 = sld [smem:[#allocation31_spill]]  ;;  %p1298_p13 = scmp.ne.s32.totalorder %s1286_s29, 0 }
  0x7d   : > { %v347_v1 = vld [vmem:[%s1294_s19] sm:$0x1] }
  0x7e   : > { %v348_v2 = vadd.f32 %v347_v1, %v346_v0  ;;  %s518_s23 = sshll.u32 %s1295_s28, 1 }
  0x7f   : > { %v344_v7 = vld [vmem:[%s1296_s15] sm:$0x1] }
  0x80   : > { %v349_v3 = vmul.f32 1.442695, %v348_v2  ;;  %v345_v9 = vadd.f32 %v344_v7, %v343_v6  ;;  %s388_s1 = scalar_lea.hbm %s1297_s6, %s518_s23  ;;  %s776_s12 = scalar_lea.hbm %s1297_s6, 4 }
  0x81   : > { %s392_s16 = sshll.u32 %s388_s1, 4  ;;  %s393_s16 = int_to_ptr.hbm [resolvable:$true] %s392_s16 }
  0x82   : > { %650 = vpow2.f32 %v349_v3  ;;  %v368_v15 = vperm.slane %v345_v9, 0  ;;  %s770_s2 = sshra.s32 %s393_s16, 4  ;;  %s771_s2 = int_to_ptr.hbm [resolvable:$true] %s770_s2 }
  0x83   : > { %s772_s22 = scalar_lea.hbm %s771_s2, 2  ;;  %p777_p5 = scmp.lt.s32.totalorder %s771_s2, %s1297_s6 }
  0x84   : > { %v370_v20 = vsub.f32 %v366_v17, %v368_v15  ;;  %p773_p7 = scmp.ne.s32.totalorder %s771_s2, %s772_s22  ;;  %p778_p12 = scmp.lt.s32.totalorder %s776_s12, %s772_s22 }
  0x86   : > { %p774_p9 = pnand %p773_p7, %p1298_p13  ;;  %p779_p1 = por %p778_p12, %p777_p5 }
  0x88   : > { %v651_v4 = vpop.eup %650  ;;  %p775_p10 = pneg %p774_p9 }
  0x89   : > { %v351_v5 = vadd.f32 0.001, %v651_v4 }
  0x8a   : > { %p780_p2 = pnand %p779_p1, %p775_p10 }
  0x8b   : > { %652 = vrcp.f32 %v351_v5  ;;  %v363_v11 = vand.u32 2147483648, %v351_v5  ;;  %vm357_vm0 = vweird.f32 %v351_v5  ;;  %v361_v13 = vand.u32 2147483647, %v351_v5 }
  0x8d   : > { %v364_v16 = vor.u32 1.1754944e-38, %v363_v11  ;;  %vm362_vm3 = vcmp.eq.f32.partialorder %v361_v13, 8.507059e+37 }
  0x91   : > { %v653_v8 = vpop.eup %652 }
  0x92   : > { %v353_v10 = vmul.f32 %v653_v8, %v351_v5  ;;  %vm358_vm1 = vweird.f32 %v653_v8 }
  0x93   : > { %vm359_vm2 = vmor %vm357_vm0, %vm358_vm1 }
  0x94   : > { %v354_v12 = vsub.f32 1.0, %v353_v10 }
  0x96   : > { %v355_v14 = vmul.f32 %v653_v8, %v354_v12 }
  0x98   : > { %v356_v18 = vadd.f32 %v653_v8, %v355_v14 }
  0x9a   : > { %v360_v19 = vsel %vm359_vm2, %v653_v8, %v356_v18 }
  0x9b   : > { %v365_v21 = vsel %vm362_vm3, %v364_v16, %v360_v19 }
  0x9c   : > { %v372_v22 = vperm.slane %v365_v21, 0 }
  0x9e   : > { %v374_v23 = vmul.f32 %v372_v22, %v370_v20 }
  0xa0   : > { %375 = vst [vmem:[%s340_s9] sm:$0x3] %v374_v23 }
  0xa1   : > { %783 = shalt.err (!%p780_p2)
}
  0xa2   : > { %531 = dma.vmem_to_hbm [thread:$0]  (%p1298_p13), %s391_s13, 32, %s393_s16, %s377_s10  }
  0xa3 PF: > { %s404_s25 = sand.u32 1, %s876_s30   ;;  %p1299_p0 = scmp.ne.s32.totalorder %s1287_s24, 0 }
  0xa4   : > { %p1300_p6 = scmp.ge.s32.totalorder %s896_s11, 2  ;;  %s405_s28 = scalar_lea.sflag [#allocation6], %s404_s25 }
  0xa6   : > { %p548_p3 = pnand %p1300_p6, %p1299_p0 }
  0xa8   : > { %p549_p4 = pneg %p548_p3 }
  0xaa   : > { %847 = dma.done.wait (%p549_p4), %s405_s28, 32  }
  0xab   : > { %849 = vsyncadd (%p549_p4), %s405_s28, 4294967264  ;;  %s33_s11 = sadd.s32 1, %s896_s11   ;;  %s1301_s29 = sld [smem:[#allocation20_spill]] }
  0xac   : > { %p30_p8 = scmp.ge.s32.totalorder %s33_s11, 4   ;;  %s1302_s18 = sld [smem:[#allocation25_spill]] }
  0xad   : > { %s1303_s21 = sld [smem:[#allocation21_spill]]  ;;  %s1307_s25 = smov %s856_s26 }
  0xae   : > { %s1304_s8 = sld [smem:[#allocation26_spill]]  ;;  %s1308_s26 = smov %s860_s27 }
  0xaf   : > { %s1305_s9 = sld [smem:[#allocation23_spill]]  ;;  %s1309_s27 = smov %s1135_s20 }
  0xb0   : > { %s1306_s10 = sld [smem:[#allocation24_spill]]  ;;  %s1310_s28 = smov %s868_s0 }
  0xb1   : > { %s1311_s0 = smov %s1301_s29  ;;  %s1313_s30 = smov %s880_s7 }
  0xb2   : > { %s1312_s29 = smov %s1302_s18  ;;  %32 = sbr.rel (!%p30_p8) target bundleno = 21 (0x15), region = 109 }
  0xb3   : > { %s1314_s7 = smov %s1303_s21 }
  0xb7   :  { %411 = vsyncpa [#allocation5], 1 }
  0xb8   :  { %413 = vsyncpa [#allocation5 + $0x1], 1 }
  0xb9   :  { %414 = vsyncpa [#allocation8], 1 }
  0xba   :  { %416 = vsyncpa [#allocation8 + $0x1], 1 }
  0xbb   :  { %417 = vsyncpa [#allocation6], 1 }
  0xbc   :  { %419 = vsyncpa [#allocation6 + $0x1], 1 }

</bundles_post_ra>
